<compile_context>
chip_gen: v6e
topology: v6e:2x2x1
jax: 0.10.0
libtpu: 0.0.40
codegen_flags: <defaults>
</compile_context>

<pallas_src>
import math

import jax
import jax.numpy as jnp
from jax import lax
from jax.experimental import pallas as pl
from jax.experimental.pallas import tpu as pltpu

_LANE = 128


def _round_up(x, m):
    return (x + m - 1) // m * m


def _sigmoid_tanh(z):
    # sigmoid(z) == 0.5 * tanh(0.5 * z) + 0.5  -- single EUP push.
    return 0.5 * jnp.tanh(0.5 * z) + 0.5


def _critic_kernel(x_ref,
                   w1_ref, b1_ref,
                   w2_ref, b2_ref,
                   w3_ref, b3_ref,
                   w4_ref, b4_ref,
                   o_ref):
    x = x_ref[...]                                           # (TB, D) bf16

    # Layer 1: contract on D -> (100, TB); batch stays on the lane axis.
    z1 = lax.dot_general(w1_ref[...], x, (((1,), (1,)), ((), ())),
                         preferred_element_type=jnp.float32) + b1_ref[...]
    h1 = _sigmoid_tanh(z1).astype(jnp.bfloat16)              # (100, TB)

    # Layer 2: (200, 100) @ (100, TB) -> (200, TB).
    z2 = jnp.dot(w2_ref[...], h1,
                 preferred_element_type=jnp.float32) + b2_ref[...]
    h2 = _sigmoid_tanh(z2).astype(jnp.bfloat16)              # (200, TB)

    # Layer 3: (100, 200) @ (200, TB) -> (100, TB).
    z3 = jnp.dot(w3_ref[...], h2,
                 preferred_element_type=jnp.float32) + b3_ref[...]
    h3 = _sigmoid_tanh(z3)                                   # (100, TB) f32, feeds VPU head

    # Head (100 -> 1): VPU multiply + sublane (XLU) reduce; w4 is a (100, 1)
    # column that broadcasts over lanes.  Result is a lane-dense (1, TB) row.
    v = jnp.sum(h3 * w4_ref[...], axis=0, keepdims=True) + b4_ref[...]   # (1, TB)
    o_ref[...] = jnp.tanh(v).reshape(1, 1, -1)               # (1, 1, TB)


def critic_forward(state, params, *, tile_b=1024):
    """state: (B, input_dims) float32 -> value: (B, 1) float32."""
    state = jnp.asarray(state, jnp.float32)
    B, D = state.shape
    (w1, b1), (w2, b2), (w3, b3), (w4, b4) = params

    # Batch sits on the lane axis inside the kernel -> tile must be a multiple
    # of 128.  Prefer >=2 grid steps when the batch is big enough so the
    # "parallel" grid axis can shard across both TensorCores on v7x.
    b128 = _round_up(B, _LANE)
    tile_b = _round_up(max(_LANE, min(tile_b, b128)), _LANE)
    if tile_b >= b128 and b128 >= 2 * _LANE:
        tile_b = _round_up(b128 // 2, _LANE)
    b_pad = _round_up(B, tile_b)
    num_tiles = b_pad // tile_b

    # Natural (B, D) layout, bf16, zero-padded batch tail (no transpose pass).
    x_bf16 = state.astype(jnp.bfloat16)
    if b_pad == B:
        x_pad = x_bf16
    else:
        x_pad = jnp.zeros((b_pad, D), jnp.bfloat16).at[:B, :].set(x_bf16)

    w1b = w1.astype(jnp.bfloat16)
    w2b = w2.astype(jnp.bfloat16)
    w3b = w3.astype(jnp.bfloat16)
    w4f = w4.astype(jnp.float32).T        # (100, 1): broadcasts over lanes in the VPU head
    b4f = b4.astype(jnp.float32)          # (1, 1)

    in_specs = [pl.BlockSpec((tile_b, D), lambda i: (i, 0))]
    # Grid-invariant weights/biases: full-extent blocks, constant index_map.
    # (pipeline_mode=pl.Buffered(1) would save ~130 KB VMEM; omitted for
    #  portability -- headroom is not needed at these sizes.)
    for arr in (w1b, b1, w2b, b2, w3b, b3, w4f, b4f):
        in_specs.append(pl.BlockSpec(arr.shape, lambda i: (0, 0)))

    out = pl.pallas_call(
        _critic_kernel,
        out_shape=jax.ShapeDtypeStruct((num_tiles, 1, tile_b), jnp.float32),
        grid_spec=pltpu.PrefetchScalarGridSpec(
            num_scalar_prefetch=0,
            grid=(num_tiles,),
            in_specs=in_specs,
            out_specs=pl.BlockSpec((1, 1, tile_b), lambda i: (i, 0, 0)),
        ),
        compiler_params=pltpu.CompilerParams(
            dimension_semantics=("parallel",)),
    )(x_pad, w1b, b1, w2b, b2, w3b, b3, w4f, b4f)

    # Lane-dense (num_tiles, 1, tile_b) -> (B, 1); drop padded batch entries.
    return out.reshape(-1)[:B].reshape(B, 1)


def init_critic_params(input_dims, key):
    """PyTorch-style Linear init: weights (out, in), biases (out, 1)."""
    dims = [(input_dims, 100), (100, 200), (200, 100), (100, 1)]
    params = []
    for fan_in, fan_out in dims:
        key, kw, kb = jax.random.split(key, 3)
        bound = 1.0 / math.sqrt(fan_in)
        w = jax.random.uniform(kw, (fan_out, fan_in), jnp.float32, -bound, bound)
        b = jax.random.uniform(kb, (fan_out, 1), jnp.float32, -bound, bound)
        params.append((w, b))
    return params


def critic_reference(state, params):
    x = state.astype(jnp.float32)
    (w1, b1), (w2, b2), (w3, b3), (w4, b4) = params
    h = jax.nn.sigmoid(x @ w1.T + b1.T)
    h = jax.nn.sigmoid(h @ w2.T + b2.T)
    h = jax.nn.sigmoid(h @ w3.T + b3.T)
    return jnp.tanh(h @ w4.T + b4.T)


if __name__ == "__main__":
    key = jax.random.PRNGKey(0)
    key, k_state, k_params = jax.random.split(key, 3)

    batch = 8
    input_dims = 32
    state = jax.random.normal(k_state, (batch, input_dims), jnp.float32)
    params = init_critic_params(input_dims, k_params)

    value = jax.block_until_ready(critic_forward(state, params))
    ref = critic_reference(state, params)
    assert value.shape == (batch, 1)
    # bf16 matmul operands -> relaxed tolerance vs the f32 reference.
    assert jnp.allclose(value, ref, atol=2e-2, rtol=2e-2), \
        float(jnp.max(jnp.abs(value - ref)))

    # Multi-tile / ragged-batch path (grid > 1, padded tail).
    key, k_big = jax.random.split(key)
    big_state = jax.random.normal(k_big, (300, input_dims), jnp.float32)
    value_big = jax.block_until_ready(critic_forward(big_state, params, tile_b=128))
    ref_big = critic_reference(big_state, params)
    assert value_big.shape == (300, 1)
    assert jnp.allclose(value_big, ref_big, atol=2e-2, rtol=2e-2)

    # Default (large) tile path with >=2-tile clamp.
    value_big2 = jax.block_until_ready(critic_forward(big_state, params))
    assert value_big2.shape == (300, 1)
    assert jnp.allclose(value_big2, ref_big, atol=2e-2, rtol=2e-2)

    print("KERNEL_OK")
</pallas_src>

<mosaic_0001>
module attributes {stable_mosaic.version = 11 : i64} {
  func.func @_critic_kernel(%arg0: i32, %arg1: memref<128x32xbf16, #tpu.memory_space<vmem>>, %arg2: memref<100x32xbf16, #tpu.memory_space<vmem>>, %arg3: memref<100x1xf32, #tpu.memory_space<vmem>>, %arg4: memref<200x100xbf16, #tpu.memory_space<vmem>>, %arg5: memref<200x1xf32, #tpu.memory_space<vmem>>, %arg6: memref<100x200xbf16, #tpu.memory_space<vmem>>, %arg7: memref<100x1xf32, #tpu.memory_space<vmem>>, %arg8: memref<100x1xf32, #tpu.memory_space<vmem>>, %arg9: memref<1x1xf32, #tpu.memory_space<vmem>>, %arg10: memref<1x1x128xf32, #tpu.memory_space<vmem>>) attributes {dimension_semantics = [#tpu.dimension_semantics<parallel>], iteration_bounds = array<i64: 1>, scalar_prefetch = 0 : i64, scratch_operands = 0 : i64, tpu.core_type = #tpu.core_type<tc>, window_params = [{transform_indices = @transform_0, window_bounds = array<i64: 128, 32>}, {pipeline_mode = #tpu.pipeline_mode<synchronous>, transform_indices = @transform_1, window_bounds = array<i64: 100, 32>}, {pipeline_mode = #tpu.pipeline_mode<synchronous>, transform_indices = @transform_2, window_bounds = array<i64: 100, 1>}, {pipeline_mode = #tpu.pipeline_mode<synchronous>, transform_indices = @transform_3, window_bounds = array<i64: 200, 100>}, {pipeline_mode = #tpu.pipeline_mode<synchronous>, transform_indices = @transform_4, window_bounds = array<i64: 200, 1>}, {pipeline_mode = #tpu.pipeline_mode<synchronous>, transform_indices = @transform_5, window_bounds = array<i64: 100, 200>}, {pipeline_mode = #tpu.pipeline_mode<synchronous>, transform_indices = @transform_6, window_bounds = array<i64: 100, 1>}, {pipeline_mode = #tpu.pipeline_mode<synchronous>, transform_indices = @transform_7, window_bounds = array<i64: 100, 1>}, {pipeline_mode = #tpu.pipeline_mode<synchronous>, transform_indices = @transform_8, window_bounds = array<i64: 1, 1>}, {transform_indices = @transform_9, window_bounds = array<i64: 1, 1, 128>}]} {
    %c0 = arith.constant 0 : index
    %c0_0 = arith.constant 0 : index
    %0 = vector.load %arg1[%c0, %c0_0] : memref<128x32xbf16, #tpu.memory_space<vmem>>, vector<128x32xbf16>
    %c0_1 = arith.constant 0 : index
    %c0_2 = arith.constant 0 : index
    %1 = vector.load %arg2[%c0_1, %c0_2] : memref<100x32xbf16, #tpu.memory_space<vmem>>, vector<100x32xbf16>
    %cst = arith.constant dense<0.000000e+00> : vector<100x128xf32>
    %2 = tpu.matmul %1, %0, %cst {dimension_numbers = #tpu.dot_dimension_numbers<[1], [1], [0], [0], [0, 0, 1, 0], [], []>} : vector<100x32xbf16>, vector<128x32xbf16>, vector<100x128xf32> -> vector<100x128xf32>
    %c0_3 = arith.constant 0 : index
    %c0_4 = arith.constant 0 : index
    %3 = vector.load %arg3[%c0_3, %c0_4] : memref<100x1xf32, #tpu.memory_space<vmem>>, vector<100x1xf32>
    %4 = vector.broadcast %3 : vector<100x1xf32> to vector<100x128xf32>
    %5 = arith.addf %2, %4 : vector<100x128xf32>
    %cst_5 = arith.constant 5.000000e-01 : f32
    %6 = vector.broadcast %cst_5 : f32 to vector<100x128xf32>
    %7 = arith.mulf %6, %5 : vector<100x128xf32>
    %8 = math.tanh %7 : vector<100x128xf32>
    %cst_6 = arith.constant 5.000000e-01 : f32
    %9 = vector.broadcast %cst_6 : f32 to vector<100x128xf32>
    %10 = arith.mulf %9, %8 : vector<100x128xf32>
    %cst_7 = arith.constant 5.000000e-01 : f32
    %11 = vector.broadcast %cst_7 : f32 to vector<100x128xf32>
    %12 = arith.addf %10, %11 : vector<100x128xf32>
    %13 = arith.truncf %12 : vector<100x128xf32> to vector<100x128xbf16>
    %c0_8 = arith.constant 0 : index
    %c0_9 = arith.constant 0 : index
    %14 = vector.load %arg4[%c0_8, %c0_9] : memref<200x100xbf16, #tpu.memory_space<vmem>>, vector<200x100xbf16>
    %cst_10 = arith.constant dense<0.000000e+00> : vector<200x128xf32>
    %15 = tpu.matmul %14, %13, %cst_10 {dimension_numbers = #tpu.dot_dimension_numbers<[1], [0], [0], [1], [0, 0, 1, 1], [], []>} : vector<200x100xbf16>, vector<100x128xbf16>, vector<200x128xf32> -> vector<200x128xf32>
    %c0_11 = arith.constant 0 : index
    %c0_12 = arith.constant 0 : index
    %16 = vector.load %arg5[%c0_11, %c0_12] : memref<200x1xf32, #tpu.memory_space<vmem>>, vector<200x1xf32>
    %17 = vector.broadcast %16 : vector<200x1xf32> to vector<200x128xf32>
    %18 = arith.addf %15, %17 : vector<200x128xf32>
    %cst_13 = arith.constant 5.000000e-01 : f32
    %19 = vector.broadcast %cst_13 : f32 to vector<200x128xf32>
    %20 = arith.mulf %19, %18 : vector<200x128xf32>
    %21 = math.tanh %20 : vector<200x128xf32>
    %cst_14 = arith.constant 5.000000e-01 : f32
    %22 = vector.broadcast %cst_14 : f32 to vector<200x128xf32>
    %23 = arith.mulf %22, %21 : vector<200x128xf32>
    %cst_15 = arith.constant 5.000000e-01 : f32
    %24 = vector.broadcast %cst_15 : f32 to vector<200x128xf32>
    %25 = arith.addf %23, %24 : vector<200x128xf32>
    %26 = arith.truncf %25 : vector<200x128xf32> to vector<200x128xbf16>
    %c0_16 = arith.constant 0 : index
    %c0_17 = arith.constant 0 : index
    %27 = vector.load %arg6[%c0_16, %c0_17] : memref<100x200xbf16, #tpu.memory_space<vmem>>, vector<100x200xbf16>
    %cst_18 = arith.constant dense<0.000000e+00> : vector<100x128xf32>
    %28 = tpu.matmul %27, %26, %cst_18 {dimension_numbers = #tpu.dot_dimension_numbers<[1], [0], [0], [1], [0, 0, 1, 1], [], []>} : vector<100x200xbf16>, vector<200x128xbf16>, vector<100x128xf32> -> vector<100x128xf32>
    %c0_19 = arith.constant 0 : index
    %c0_20 = arith.constant 0 : index
    %29 = vector.load %arg7[%c0_19, %c0_20] : memref<100x1xf32, #tpu.memory_space<vmem>>, vector<100x1xf32>
    %30 = vector.broadcast %29 : vector<100x1xf32> to vector<100x128xf32>
    %31 = arith.addf %28, %30 : vector<100x128xf32>
    %cst_21 = arith.constant 5.000000e-01 : f32
    %32 = vector.broadcast %cst_21 : f32 to vector<100x128xf32>
    %33 = arith.mulf %32, %31 : vector<100x128xf32>
    %34 = math.tanh %33 : vector<100x128xf32>
    %cst_22 = arith.constant 5.000000e-01 : f32
    %35 = vector.broadcast %cst_22 : f32 to vector<100x128xf32>
    %36 = arith.mulf %35, %34 : vector<100x128xf32>
    %cst_23 = arith.constant 5.000000e-01 : f32
    %37 = vector.broadcast %cst_23 : f32 to vector<100x128xf32>
    %38 = arith.addf %36, %37 : vector<100x128xf32>
    %c0_24 = arith.constant 0 : index
    %c0_25 = arith.constant 0 : index
    %39 = vector.load %arg8[%c0_24, %c0_25] : memref<100x1xf32, #tpu.memory_space<vmem>>, vector<100x1xf32>
    %40 = vector.broadcast %39 : vector<100x1xf32> to vector<100x128xf32>
    %41 = arith.mulf %38, %40 : vector<100x128xf32>
    %cst_26 = arith.constant dense<0.000000e+00> : vector<128xf32>
    %42 = vector.multi_reduction <add>, %41, %cst_26 [0] : vector<100x128xf32> to vector<128xf32>
    %43 = vector.shape_cast %42 : vector<128xf32> to vector<1x128xf32>
    %c0_27 = arith.constant 0 : index
    %c0_28 = arith.constant 0 : index
    %44 = vector.load %arg9[%c0_27, %c0_28] : memref<1x1xf32, #tpu.memory_space<vmem>>, vector<1x1xf32>
    %45 = vector.broadcast %44 : vector<1x1xf32> to vector<1x128xf32>
    %46 = arith.addf %43, %45 : vector<1x128xf32>
    %47 = math.tanh %46 : vector<1x128xf32>
    %48 = vector.shape_cast %47 : vector<1x128xf32> to vector<1x1x128xf32>
    %c0_29 = arith.constant 0 : index
    %c0_30 = arith.constant 0 : index
    %c0_31 = arith.constant 0 : index
    %49 = vector.load %arg10[%c0_29, %c0_30, %c0_31] : memref<1x1x128xf32, #tpu.memory_space<vmem>>, vector<1x1x128xf32>
    tpu.vector_store %arg10[%c0_29, %c0_30, %c0_31], %48 {strides = array<i32>} : memref<1x1x128xf32, #tpu.memory_space<vmem>>, vector<1x1x128xf32>,
    return
  }
  func.func @transform_0(%arg0: i32) -> (i32, i32) {
    %c0_i32 = arith.constant 0 : i32
    %c0_i32_0 = arith.constant 0 : i32
    return %arg0, %c0_i32 : i32, i32
  }
  func.func @transform_1(%arg0: i32) -> (i32, i32) {
    %c0_i32 = arith.constant 0 : i32
    %c0_i32_0 = arith.constant 0 : i32
    %c0_i32_1 = arith.constant 0 : i32
    return %c0_i32, %c0_i32_0 : i32, i32
  }
  func.func @transform_2(%arg0: i32) -> (i32, i32) {
    %c0_i32 = arith.constant 0 : i32
    %c0_i32_0 = arith.constant 0 : i32
    %c0_i32_1 = arith.constant 0 : i32
    return %c0_i32, %c0_i32_0 : i32, i32
  }
  func.func @transform_3(%arg0: i32) -> (i32, i32) {
    %c0_i32 = arith.constant 0 : i32
    %c0_i32_0 = arith.constant 0 : i32
    %c0_i32_1 = arith.constant 0 : i32
    return %c0_i32, %c0_i32_0 : i32, i32
  }
  func.func @transform_4(%arg0: i32) -> (i32, i32) {
    %c0_i32 = arith.constant 0 : i32
    %c0_i32_0 = arith.constant 0 : i32
    %c0_i32_1 = arith.constant 0 : i32
    return %c0_i32, %c0_i32_0 : i32, i32
  }
  func.func @transform_5(%arg0: i32) -> (i32, i32) {
    %c0_i32 = arith.constant 0 : i32
    %c0_i32_0 = arith.constant 0 : i32
    %c0_i32_1 = arith.constant 0 : i32
    return %c0_i32, %c0_i32_0 : i32, i32
  }
  func.func @transform_6(%arg0: i32) -> (i32, i32) {
    %c0_i32 = arith.constant 0 : i32
    %c0_i32_0 = arith.constant 0 : i32
    %c0_i32_1 = arith.constant 0 : i32
    return %c0_i32, %c0_i32_0 : i32, i32
  }
  func.func @transform_7(%arg0: i32) -> (i32, i32) {
    %c0_i32 = arith.constant 0 : i32
    %c0_i32_0 = arith.constant 0 : i32
    %c0_i32_1 = arith.constant 0 : i32
    return %c0_i32, %c0_i32_0 : i32, i32
  }
  func.func @transform_8(%arg0: i32) -> (i32, i32) {
    %c0_i32 = arith.constant 0 : i32
    %c0_i32_0 = arith.constant 0 : i32
    %c0_i32_1 = arith.constant 0 : i32
    return %c0_i32, %c0_i32_0 : i32, i32
  }
  func.func @transform_9(%arg0: i32) -> (i32, i32, i32) {
    %c0_i32 = arith.constant 0 : i32
    %c0_i32_0 = arith.constant 0 : i32
    %c0_i32_1 = arith.constant 0 : i32
    return %arg0, %c0_i32, %c0_i32_0 : i32, i32, i32
  }
}

</mosaic_0001>

<bundles_post_ra>
// kernel: tpu_custom_call.1
= control target key start
LH: loop header
LB: loop body
LE: loop exit
PB: predicated region body
PF: predicated region fallthrough
CT: control target
= control target key end

     0   :  { %s2398_s0 = inlined_call_operand.vmem [shape: bf16[128,32], index: 0, kind: input, shape index: {}]   ;;  %s2399_s1 = inlined_call_operand.vmem [shape: bf16[100,32], index: 1, kind: input, shape index: {}]   ;;  %s2400_s2 = inlined_call_operand.vmem [shape: f32[100,1], index: 2, kind: input, shape index: {}]   ;;  %s2401_s3 = inlined_call_operand.vmem [shape: bf16[200,100], index: 3, kind: input, shape index: {}]   ;;  %s2402_s4 = inlined_call_operand.vmem [shape: f32[200,1], index: 4, kind: input, shape index: {}]   ;;  %s2403_s5 = inlined_call_operand.vmem [shape: bf16[100,200], index: 5, kind: input, shape index: {}]   ;;  %s2404_s6 = inlined_call_operand.vmem [shape: f32[100,1], index: 6, kind: input, shape index: {}]   ;;  %s2405_s7 = inlined_call_operand.vmem [shape: f32[100,1], index: 7, kind: input, shape index: {}]   ;;  %s2406_s8 = inlined_call_operand.<no memory space> [shape: f32[1,1], index: 8, kind: input, shape index: {}]   ;;  %s2407_s9 = inlined_call_operand.hbm [shape: f32[1,1,128], index: 9, kind: output, shape index: {}]  }
   0x1   :  { %v14_v0 = vstv %s2406_s8 }
   0x2   :  { %15 = vst [vmem:[#allocation2] sm:$0x1] %v14_v0 }
   0x3   :  { %v1640_v1 = vld [vmem:[%s2398_s0 + $0x38] sm:$0xff]   ;;  %v1814_v2 = vmov 0.0   ;;  %vm216_vm0 = vcmask 261120   ;;  %v1641_v4 = vld [vmem:[%s2398_s0 + $0x30] sm:$0xff]   ;;  %v77_v5 = vld [vmem:[%s2400_s2 + $0x60] sm:$0xf] }
   0x4   :  { %1498 = vmatprep.subr.bf16.mxu0 %v1814_v2  ;;  %1542 = vmatprep.subr.bf16.mxu1 %v1814_v2  ;;  %v260_v3 = vsel %vm216_vm0, %v1640_v1, 0  ;;  %v257_v6 = vsel %vm216_vm0, %v1641_v4, 0  ;;  %v1815_v7 = vmov 0   ;;  %v76_v8 = vld [vmem:[%s2400_s2 + $0x58] sm:$0xff]  ;;  %v75_v9 = vld [vmem:[%s2400_s2 + $0x50] sm:$0xff]  ;;  %vm1816_vm1 = vmmov 0  }
   0x5   :  { %1499 = vmatpush3.bf16.xpose.msra.mxu0 %v260_v3  ;;  %1638 = vset.pattern.permute.xlu0 %v1815_v7  ;;  %v73_v10 = vld [vmem:[%s2400_s2 + $0x40] sm:$0xff]  ;;  %v1642_v11 = vld [vmem:[%s2398_s0 + $0x28] sm:$0xff]   ;;  %v71_v13 = vld [vmem:[%s2400_s2 + $0x30] sm:$0xff] }
   0x6   :  { %1500 = vmatprep.subr.bf16.mxu0 %v1814_v2  ;;  %1639 = vset.pattern.permute.xlu1 %v1815_v7  ;;  %v74_v12 = vld [vmem:[%s2400_s2 + $0x48] sm:$0xff]  ;;  %v254_v14 = vsel %vm216_vm0, %v1642_v11, 0  ;;  %v72_v15 = vld [vmem:[%s2400_s2 + $0x38] sm:$0xff]  ;;  %v69_v16 = vld [vmem:[%s2400_s2 + $0x20] sm:$0xff] }
   0x7   :  { %140 = vperm.xlu0 %1638, %v77_v5   ;;  %135 = vperm.xlu1 %1639, %v76_v8   ;;  %v1643_v17 = vld [vmem:[%s2398_s0 + $0x20] sm:$0xff]   ;;  %v70_v18 = vld [vmem:[%s2400_s2 + $0x28] sm:$0xff]  ;;  %v67_v19 = vld [vmem:[%s2400_s2 + $0x10] sm:$0xff] }
   0x8   :  { %1514 = vmatprep.mubr.msk.bf16.mxu0 %vm1816_vm1, %v1814_v2  ;;  %1556 = vmatprep.mubr.msk.bf16.mxu1 %vm1816_vm1, %v1814_v2  ;;  %v251_v20 = vsel %vm216_vm0, %v1643_v17, 0  ;;  %v68_v21 = vld [vmem:[%s2400_s2 + $0x18] sm:$0xff]  ;;  %v65_v22 = vld [vmem:[%s2400_s2] sm:$0xff]  ;;  %v66_v24 = vld [vmem:[%s2400_s2 + $0x8] sm:$0xff] }
   0x9   :  { %v1644_v23 = vld [vmem:[%s2398_s0 + $0x18] sm:$0xff]   ;;  %v448_v25 = vld [vmem:[%s2402_s4 + $0x70] sm:$0xff]  ;;  %v446_v29 = vld [vmem:[%s2402_s4 + $0x60] sm:$0xff] }
   0xa   :  { %v248_v26 = vsel %vm216_vm0, %v1644_v23, 0  ;;  %v1645_v27 = vld [vmem:[%s2398_s0 + $0x10] sm:$0xff]   ;;  %v449_v28 = vld [vmem:[%s2402_s4 + $0x78] sm:$0xff]  ;;  %v447_v31 = vld [vmem:[%s2402_s4 + $0x68] sm:$0xff] }
   0xb   :  { %130 = vperm.xlu0 %1638, %v75_v9   ;;  %120 = vperm.xlu1 %1639, %v73_v10   ;;  %v245_v30 = vsel %vm216_vm0, %v1645_v27, 0  ;;  %v444_v32 = vld [vmem:[%s2402_s4 + $0x50] sm:$0xff]  ;;  %v445_v33 = vld [vmem:[%s2402_s4 + $0x58] sm:$0xff]  ;;  %v442_v34 = vld [vmem:[%s2402_s4 + $0x40] sm:$0xff] }
   0xc   :  { %v1646_v35 = vld [vmem:[%s2398_s0 + $0x8] sm:$0xff]   ;;  %v440_v37 = vld [vmem:[%s2402_s4 + $0x30] sm:$0xff] }
   0xd   :  { %1501 = vmatpush3.bf16.xpose.msra.mxu0 %v257_v6  ;;  %v443_v36 = vld [vmem:[%s2402_s4 + $0x48] sm:$0xff]  ;;  %v242_v38 = vsel %vm216_vm0, %v1646_v35, 0 }
   0xe   :  { %1502 = vmatprep.subr.bf16.mxu0 %v1814_v2 }
   0xf   :  { %125 = vperm.xlu0 %1638, %v74_v12   ;;  %110 = vperm.xlu1 %1639, %v71_v13  }
  0x13   :  { %115 = vperm.xlu0 %1638, %v72_v15   ;;  %100 = vperm.xlu1 %1639, %v69_v16  }
  0x15   :  { %1503 = vmatpush3.bf16.xpose.msra.mxu0 %v254_v14 }
  0x16   :  { %1504 = vmatprep.subr.bf16.mxu0 %v1814_v2 }
  0x17   :  { %105 = vperm.xlu0 %1638, %v70_v18   ;;  %90 = vperm.xlu1 %1639, %v67_v19  }
  0x1b   :  { %95 = vperm.xlu0 %1638, %v68_v21   ;;  %80 = vperm.xlu1 %1639, %v65_v22  }
  0x1d   :  { %1505 = vmatpush3.bf16.xpose.msra.mxu0 %v251_v20 }
  0x1e   :  { %1506 = vmatprep.subr.bf16.mxu0 %v1814_v2 }
  0x1f   :  { %85 = vperm.xlu0 %1638, %v66_v24   ;;  %531 = vperm.xlu1 %1639, %v448_v25  }
  0x23   :  { %536 = vperm.xlu0 %1638, %v449_v28   ;;  %521 = vperm.xlu1 %1639, %v446_v29  }
  0x25   :  { %1507 = vmatpush3.bf16.xpose.msra.mxu0 %v248_v26 }
  0x26   :  { %1508 = vmatprep.subr.bf16.mxu0 %v1814_v2 }
  0x27   :  { %526 = vperm.xlu0 %1638, %v447_v31   ;;  %511 = vperm.xlu1 %1639, %v444_v32  }
  0x2b   :  { %516 = vperm.xlu0 %1638, %v445_v33   ;;  %501 = vperm.xlu1 %1639, %v442_v34  }
  0x2d   :  { %1509 = vmatpush3.bf16.xpose.msra.mxu0 %v245_v30 }
  0x2e   :  { %1510 = vmatprep.subr.bf16.mxu0 %v1814_v2 }
  0x2f   :  { %16 = vsyncpa [#allocation4], 0  ;;  %506 = vperm.xlu0 %1638, %v443_v36   ;;  %v441_v39 = vld [vmem:[%s2402_s4 + $0x38] sm:$0xff]  ;;  %491 = vperm.xlu1 %1639, %v440_v37   ;;  %v438_v40 = vld [vmem:[%s2402_s4 + $0x20] sm:$0xff]  ;;  %vm687_vm2 = vcmask 1041408   ;;  %vm647_vm3 = vcmask 818176  }
  0x30   :  { %v1647_v41 = vld [vmem:[%s2398_s0] sm:$0xff]   ;;  %v439_v42 = vld [vmem:[%s2402_s4 + $0x28] sm:$0xff]  ;;  %v436_v43 = vld [vmem:[%s2402_s4 + $0x10] sm:$0xff]  ;;  %vm1091_vm4 = vcmask 588800   ;;  %vm1113_vm5 = vcmask 1043456  }
  0x31   :  { %v239_v44 = vsel %vm216_vm0, %v1647_v41, 0  ;;  %v437_v45 = vld [vmem:[%s2402_s4 + $0x18] sm:$0xff]  ;;  %v434_v46 = vld [vmem:[%s2402_s4] sm:$0xff]  ;;  %v435_v48 = vld [vmem:[%s2402_s4 + $0x8] sm:$0xff] }
  0x32   :  { %v1648_v47 = vld [vmem:[%s2399_s1] sm:$0xff]   ;;  %v456_v50 = vld [vmem:[%s2402_s4 + $0xb0] sm:$0xff]  ;;  %v457_v51 = vld [vmem:[%s2402_s4 + $0xb8] sm:$0xff] }
  0x33   :  { %496 = vperm.xlu0 %1638, %v441_v39   ;;  %481 = vperm.xlu1 %1639, %v438_v40   ;;  %v458_v49 = vld [vmem:[%s2402_s4 + $0xc0] sm:$0xff]  ;;  %v1649_v52 = vld [vmem:[%s2399_s1 + $0x8] sm:$0xff]   ;;  %v452_v55 = vld [vmem:[%s2402_s4 + $0x90] sm:$0xff] }
  0x34   :  { %v454_v53 = vld [vmem:[%s2402_s4 + $0xa0] sm:$0xff]  ;;  %v455_v54 = vld [vmem:[%s2402_s4 + $0xa8] sm:$0xff]  ;;  %v453_v56 = vld [vmem:[%s2402_s4 + $0x98] sm:$0xff] }
  0x35   :  { %1511 = vmatpush3.bf16.xpose.msra.mxu0 %v242_v38  ;;  %v1650_v57 = vld [vmem:[%s2399_s1 + $0x10] sm:$0xff]   ;;  %v450_v58 = vld [vmem:[%s2402_s4 + $0x80] sm:$0xff]  ;;  %v451_v59 = vld [vmem:[%s2402_s4 + $0x88] sm:$0xff] }
  0x36   :  { %1512 = vmatprep.subr.bf16.mxu0 %v1814_v2  ;;  %v953_v60 = vld [vmem:[%s2404_s6] sm:$0xff]  ;;  %v954_v61 = vld [vmem:[%s2404_s6 + $0x8] sm:$0xff]  ;;  %v1651_v62 = vld [vmem:[%s2399_s1 + $0x18] sm:$0xff]  }
  0x37   :  { %486 = vperm.xlu0 %1638, %v439_v42   ;;  %471 = vperm.xlu1 %1639, %v436_v43   ;;  %v955_v63 = vld [vmem:[%s2404_s6 + $0x10] sm:$0xff]  ;;  %v956_v0 = vld [vmem:[%s2404_s6 + $0x18] sm:$0xff]  ;;  %v957_v1 = vld [vmem:[%s2404_s6 + $0x20] sm:$0xff] }
  0x38   :  { %v958_v3 = vld [vmem:[%s2404_s6 + $0x28] sm:$0xff]  ;;  %v1652_v4 = vld [vmem:[%s2399_s1 + $0x20] sm:$0xff]   ;;  %v959_v5 = vld [vmem:[%s2404_s6 + $0x30] sm:$0xff] }
  0x39   :  { %v960_v6 = vld [vmem:[%s2404_s6 + $0x38] sm:$0xff]  ;;  %v961_v8 = vld [vmem:[%s2404_s6 + $0x40] sm:$0xff]  ;;  %v962_v9 = vld [vmem:[%s2404_s6 + $0x48] sm:$0xff] }
  0x3a   :  { %v1653_v10 = vld [vmem:[%s2399_s1 + $0x28] sm:$0xff]   ;;  %v963_v11 = vld [vmem:[%s2404_s6 + $0x50] sm:$0xff]  ;;  %v964_v12 = vld [vmem:[%s2404_s6 + $0x58] sm:$0xff] }
  0x3b   :  { %476 = vperm.xlu0 %1638, %v437_v45   ;;  %461 = vperm.xlu1 %1639, %v434_v46   ;;  %v965_v13 = vld [vmem:[%s2404_s6 + $0x60] sm:$0xf]  ;;  %v1654_v15 = vld [vmem:[%s2399_s1 + $0x30] ss:$0 sps:$4 sm:$0x33]   ;;  %v1258_v16 = vld [vmem:[%s2405_s7 + $0x8] sm:$0xff] }
  0x3c   :  { %v1257_v14 = vld [vmem:[%s2405_s7] sm:$0xff]  ;;  %v1259_v17 = vld [vmem:[%s2405_s7 + $0x10] sm:$0xff]  ;;  %v1260_v18 = vld [vmem:[%s2405_s7 + $0x18] sm:$0xff] }
  0x3d   :  { %1513 = vmatpush3.bf16.xpose.msra.mxu0 %v239_v44  ;;  %v1261_v19 = vld [vmem:[%s2405_s7 + $0x20] sm:$0xff]  ;;  %v1262_v20 = vld [vmem:[%s2405_s7 + $0x28] sm:$0xff]  ;;  %v1263_v21 = vld [vmem:[%s2405_s7 + $0x30] sm:$0xff] }
  0x3e   :  { %1117 = vmatprep.subr.bf16.mxu0 %v1815_v7  ;;  %v1264_v22 = vld [vmem:[%s2405_s7 + $0x38] sm:$0xff]  ;;  %v1265_v23 = vld [vmem:[%s2405_s7 + $0x40] sm:$0xff]  ;;  %v1266_v24 = vld [vmem:[%s2405_s7 + $0x48] sm:$0xff] }
  0x3f   :  { %466 = vperm.xlu0 %1638, %v435_v48   ;;  %581 = vperm.xlu1 %1639, %v458_v49   ;;  %v1267_v25 = vld [vmem:[%s2405_s7 + $0x50] sm:$0xff]  ;;  %v1268_v26 = vld [vmem:[%s2405_s7 + $0x58] sm:$0xff]  ;;  %v1269_v27 = vld [vmem:[%s2405_s7 + $0x60] sm:$0xf] }
  0x40   :  { %v1367_v28 = vld [vmem:[#allocation2] sm:$0x1] }
  0x43   :  { %571 = vperm.xlu0 %1638, %v456_v50   ;;  %576 = vperm.xlu1 %1639, %v457_v51  }
  0x44   :  { %1515 = vmatmul.mubr.msk.bf16.vlgmr.msra.gmra.mxu0 %vm216_vm0, %v1648_v47 }
  0x45   :  { %1518 = vmatprep.mubr.msk.bf16.mxu0 %vm1816_vm1, %v1814_v2 }
  0x47   :  { %561 = vperm.xlu0 %1638, %v454_v53   ;;  %566 = vperm.xlu1 %1639, %v455_v54  }
  0x4b   :  { %551 = vperm.xlu0 %1638, %v452_v55   ;;  %556 = vperm.xlu1 %1639, %v453_v56  }
  0x4c   :  { %1519 = vmatmul.mubr.msk.bf16.gmra.mxu0 %vm216_vm0, %v1649_v52 }
  0x4d   :  { %1522 = vmatprep.mubr.msk.bf16.mxu0 %vm1816_vm1, %v1814_v2 }
  0x4f   :  { %541 = vperm.xlu0 %1638, %v450_v58   ;;  %546 = vperm.xlu1 %1639, %v451_v59  }
  0x53   :  { %968 = vperm.xlu0 %1638, %v953_v60   ;;  %973 = vperm.xlu1 %1639, %v954_v61  }
  0x54   :  { %1523 = vmatmul.mubr.msk.bf16.gmra.mxu0 %vm216_vm0, %v1650_v57 }
  0x55   :  { %1526 = vmatprep.mubr.msk.bf16.mxu0 %vm1816_vm1, %v1814_v2 }
  0x57   :  { %978 = vperm.xlu0 %1638, %v955_v63   ;;  %983 = vperm.xlu1 %1639, %v956_v0  }
  0x5b   :  { %988 = vperm.xlu0 %1638, %v957_v1   ;;  %993 = vperm.xlu1 %1639, %v958_v3  }
  0x5c   :  { %1527 = vmatmul.mubr.msk.bf16.gmra.mxu0 %vm216_vm0, %v1651_v62 }
  0x5d   :  { %1530 = vmatprep.mubr.msk.bf16.mxu0 %vm1816_vm1, %v1814_v2 }
  0x5f   :  { %998 = vperm.xlu0 %1638, %v959_v5   ;;  %1003 = vperm.xlu1 %1639, %v960_v6  }
  0x63   :  { %1008 = vperm.xlu0 %1638, %v961_v8   ;;  %1013 = vperm.xlu1 %1639, %v962_v9  }
  0x64   :  { %1531 = vmatmul.mubr.msk.bf16.gmra.mxu0 %vm216_vm0, %v1652_v4 }
  0x65   :  { %1534 = vmatprep.mubr.msk.bf16.mxu0 %vm1816_vm1, %v1814_v2 }
  0x67   :  { %1018 = vperm.xlu0 %1638, %v963_v11   ;;  %1023 = vperm.xlu1 %1639, %v964_v12  }
  0x6b   :  { %1028 = vperm.xlu0 %1638, %v965_v13   ;;  %1272 = vperm.xlu1 %1639, %v1257_v14  }
  0x6c   :  { %1535 = vmatmul.mubr.msk.bf16.gmra.mxu0 %vm216_vm0, %v1653_v10 }
  0x6d   :  { %1538 = vmatprep.mubr.msk.bf16.mxu0 %vm1816_vm1, %v1814_v2 }
  0x6f   :  { %1277 = vperm.xlu0 %1638, %v1258_v16   ;;  %1282 = vperm.xlu1 %1639, %v1259_v17  }
  0x73   :  { %1287 = vperm.xlu0 %1638, %v1260_v18   ;;  %1292 = vperm.xlu1 %1639, %v1261_v19  }
  0x74   :  { %1539 = vmatmul.mubr.msk.bf16.gmra.mxu0 %vm216_vm0, %v1654_v15 }
  0x77   :  { %1297 = vperm.xlu0 %1638, %v1262_v20   ;;  %1302 = vperm.xlu1 %1639, %v1263_v21  }
  0x7b   :  { %1307 = vperm.xlu0 %1638, %v1264_v22   ;;  %1312 = vperm.xlu1 %1639, %v1265_v23  }
  0x7f   :  { %1317 = vperm.xlu0 %1638, %v1266_v24   ;;  %1322 = vperm.xlu1 %1639, %v1267_v25  }
  0x82   :  { %v141_v29 = vpop.permute.xlu0 %140  ;;  %v136_v30 = vpop.permute.xlu1 %135 }
  0x83   :  { %1327 = vperm.xlu0 %1638, %v1268_v26   ;;  %1332 = vperm.xlu1 %1639, %v1269_v27  }
  0x86   :  { %v131_v31 = vpop.permute.xlu0 %130  ;;  %v121_v32 = vpop.permute.xlu1 %120 }
  0x87   :  { %1370 = vperm.xlu0 %1638, %v1367_v28  }
  0x8a   :  { %v126_v33 = vpop.permute.xlu0 %125  ;;  %v111_v34 = vpop.permute.xlu1 %110 }
  0x8e   :  { %v116_v35 = vpop.permute.xlu0 %115  ;;  %v2151_v36 = vpop.permute.xlu1 %100 }
  0x92   :  { %v106_v37 = vpop.permute.xlu0 %105  ;;  %v2153_v38 = vpop.permute.xlu1 %90 }
  0x96   :  { %v2155_v39 = vpop.permute.xlu0 %95  ;;  %v81_v40 = vpop.permute.xlu1 %80 }
  0x9a   :  { %v86_v45 = vpop.permute.xlu0 %85 }
 0x104   :  { %v296_v41 = vpop.f32.mrf.mxu0 }
 0x105   :  { %v297_v42 = vadd.f32 %v296_v41, %v81_v40 }
 0x106   :  { %v1516_v43 = vpop.f32.mrf.mxu0 }
 0x107   :  { %v350_v44 = vmul.f32 0.5, %v297_v42 }
 0x108   :  { %v299_v46 = vpop.f32.mrf.mxu0 }
 0x109   :  { %1688 = vtanh.f32 %v350_v44  ;;  %v300_v47 = vadd.f32 %v299_v46, %v86_v45 }
 0x10a   :  { %v1517_v48 = vpop.f32.mrf.mxu0 }
 0x10b   :  { %v351_v49 = vmul.f32 0.5, %v300_v47 }
 0x10c   :  { %v304_v50 = vpop.f32.mrf.mxu0 }
 0x10d   :  { %1690 = vtanh.f32 %v351_v49 }
 0x10e   :  { %v1520_v51 = vpop.f32.mrf.mxu0 }
 0x110   :  { %v307_v52 = vpop.f32.mrf.mxu0 }
 0x112   :  { %v1521_v53 = vpop.f32.mrf.mxu0 }
 0x114   :  { %v312_v54 = vpop.f32.mrf.mxu0 }
 0x116   :  { %v1689_v55 = vpop.eup %1688  ;;  %v1524_v56 = vpop.f32.mrf.mxu0 }
 0x117   :  { %v376_v58 = vmul.f32 0.5, %v1689_v55 }
 0x118   :  { %v315_v57 = vpop.f32.mrf.mxu0 }
 0x119   :  { %v2157_v63 = vadd.f32 0.5, %v376_v58 }
 0x11a   :  { %v1691_v59 = vpop.eup %1690  ;;  %v1525_v60 = vpop.f32.mrf.mxu0 }
 0x11b   :  { %v377_v61 = vmul.f32 0.5, %v1691_v59 }
 0x11c   :  { %v320_v62 = vpop.f32.mrf.mxu0 }
 0x11d   :  { %v2159_v0 = vadd.f32 0.5, %v377_v61  ;;  %v321_v28 = vadd.f32 %v320_v62, %v111_v34 }
 0x11e   :  { %v1528_v1 = vpop.f32.mrf.mxu0 }
 0x11f   :  { %v402_v3 = vpack.c.bf16 %v2159_v0, %v2157_v63  ;;  %v356_v42 = vmul.f32 0.5, %v321_v28  ;;  %v1657_v63 = vld [vmem:[%s2401_s3 + $0x10] sm:$0xff]   ;;  %v1658_v0 = vld [vmem:[%s2401_s3 + $0x18] sm:$0xff]   ;;  %v1664_v28 = vld [vmem:[%s2401_s3 + $0x48] sm:$0xff]  }
 0x120   :  { %v323_v4 = vpop.f32.mrf.mxu0 }
 0x121   :  { %v324_v25 = vadd.f32 %v323_v4, %v116_v35  ;;  %v305_v35 = vadd.f32 %v304_v50, %v2153_v38 }
 0x122   :  { %v1529_v5 = vpop.f32.mrf.mxu0 }
 0x123   :  { %v352_v46 = vmul.f32 0.5, %v305_v35 }
 0x124   :  { %v328_v6 = vpop.f32.mrf.mxu0 }
 0x125   :  { %v329_v21 = vadd.f32 %v328_v6, %v121_v32 }
 0x126   :  { %v1532_v8 = vpop.f32.mrf.mxu0 }
 0x127   :  { %v358_v40 = vmul.f32 0.5, %v329_v21 }
 0x128   :  { %v331_v9 = vpop.f32.mrf.mxu0 }
 0x129   :  { %v332_v17 = vadd.f32 %v331_v9, %v126_v33  ;;  %v313_v33 = vadd.f32 %v312_v54, %v2151_v36 }
 0x12a   :  { %v1533_v10 = vpop.f32.mrf.mxu0 }
 0x12b   :  { %v359_v26 = vmul.f32 0.5, %v332_v17  ;;  %v354_v43 = vmul.f32 0.5, %v313_v33  ;;  %v2254_v33 = vpop.permute.xlu0 %536 }
 0x12c   :  { %v336_v11 = vpop.f32.mrf.mxu0 }
 0x12d   :  { %v337_v15 = vadd.f32 %v336_v11, %v131_v31  ;;  %v357_v31 = vmul.f32 0.5, %v324_v25  ;;  %v1661_v25 = vld [vmem:[%s2401_s3 + $0x30] sm:$0xff]  }
 0x12e   :  { %v1536_v12 = vpop.f32.mrf.mxu0 }
 0x12f   :  { %v360_v22 = vmul.f32 0.5, %v337_v15 }
 0x130   :  { %v339_v13 = vpop.f32.mrf.mxu0 }
 0x131   :  { %v340_v14 = vadd.f32 %v339_v13, %v136_v30  ;;  %v316_v30 = vadd.f32 %v315_v57, %v106_v37 }
 0x132   :  { %v1537_v16 = vpop.f32.mrf.mxu0 }
 0x133   :  { %v361_v18 = vmul.f32 0.5, %v340_v14  ;;  %v355_v32 = vmul.f32 0.5, %v316_v30  ;;  %v1667_v30 = vld [vmem:[%s2401_s3 + $0x60] ss:$0 sps:$4 sm:$0xff]  }
 0x134   :  { %v344_v19 = vpop.f32.mrf.mxu0 }
 0x135   :  { %v345_v20 = vadd.f32 %v344_v19, %v141_v29  ;;  %1692 = vtanh.f32 %v361_v18  ;;  %v308_v29 = vadd.f32 %v307_v52, %v2155_v39 }
 0x136   :  { %v1540_v23 = vpop.f32.mrf.mxu0 }
 0x137   :  { %v362_v24 = vmul.f32 0.5, %v345_v20  ;;  %v353_v44 = vmul.f32 0.5, %v308_v29  ;;  %v1656_v23 = vld [vmem:[%s2401_s3 + $0x8] sm:$0xff]   ;;  %v2258_v29 = vpop.permute.xlu0 %526 }
 0x138   :  { %v347_v27 = vpop.f32.mrf.mxu0 }
 0x139   :  { %1694 = vtanh.f32 %v362_v24  ;;  %v1660_v24 = vld [vmem:[%s2401_s3 + $0x28] sm:$0xff]   ;;  %v1663_v27 = vld [vmem:[%s2401_s3 + $0x40] sm:$0xff]  }
 0x13a   :  { %1696 = vtanh.f32 %v360_v22  ;;  %v1541_v41 = vpop.f32.mrf.mxu0  ;;  %v1655_v22 = vld [vmem:[%s2401_s3] sm:$0xff]  }
 0x13b   :  { %1698 = vtanh.f32 %v359_v26  ;;  %v1662_v26 = vld [vmem:[%s2401_s3 + $0x38] sm:$0xff]   ;;  %v2262_v35 = vpop.permute.xlu0 %516 }
 0x13c   :  { %1700 = vtanh.f32 %v358_v40  ;;  %v1665_v40 = vld [vmem:[%s2401_s3 + $0x50] sm:$0xff]   ;;  %v1666_v41 = vld [vmem:[%s2401_s3 + $0x58] sm:$0xff]  }
 0x13d   :  { %1702 = vtanh.f32 %v357_v31  ;;  %v2252_v31 = vpop.permute.xlu1 %531 }
 0x13e   :  { %1704 = vtanh.f32 %v356_v42 }
 0x13f   :  { %1706 = vtanh.f32 %v355_v32 }
 0x140   :  { %1708 = vtanh.f32 %v354_v43 }
 0x141   :  { %1710 = vtanh.f32 %v353_v44  ;;  %v2256_v42 = vpop.permute.xlu1 %521 }
 0x142   :  { %v1693_v34 = vpop.eup %1692  ;;  %1712 = vtanh.f32 %v352_v46 }
 0x143   :  { %v387_v36 = vmul.f32 0.5, %v1693_v34 }
 0x145   :  { %v400_v50 = vadd.f32 0.5, %v387_v36  ;;  %v2260_v32 = vpop.permute.xlu1 %511 }
 0x146   :  { %v1695_v45 = vpop.eup %1694 }
 0x147   :  { %v1697_v37 = vpop.eup %1696  ;;  %v388_v47 = vmul.f32 0.5, %v1695_v45 }
 0x148   :  { %v1699_v48 = vpop.eup %1698  ;;  %v386_v39 = vmul.f32 0.5, %v1697_v37 }
 0x149   :  { %v401_v49 = vadd.f32 0.5, %v388_v47  ;;  %v1701_v51 = vpop.eup %1700  ;;  %v385_v38 = vmul.f32 0.5, %v1699_v48  ;;  %v2264_v43 = vpop.permute.xlu1 %501 }
 0x14a   :  { %v1703_v53 = vpop.eup %1702  ;;  %v384_v55 = vmul.f32 0.5, %v1701_v51  ;;  %v399_v56 = vadd.f32 0.5, %v386_v39 }
 0x14b   :  { %v408_v52 = vpack.c.bf16 %v401_v49, %v401_v49  ;;  %v1705_v57 = vpop.eup %1704  ;;  %v383_v58 = vmul.f32 0.5, %v1703_v53  ;;  %v398_v59 = vadd.f32 0.5, %v385_v38 }
 0x14c   :  { %v407_v60 = vpack.c.bf16 %v400_v50, %v399_v56  ;;  %v1707_v61 = vpop.eup %1706  ;;  %v382_v62 = vmul.f32 0.5, %v1705_v57  ;;  %v397_v1 = vadd.f32 0.5, %v384_v55 }
 0x14d   :  { %v689_v54 = vsel %vm687_vm2, %v408_v52, 0  ;;  %v1709_v4 = vpop.eup %1708  ;;  %v381_v5 = vmul.f32 0.5, %v1707_v61  ;;  %v396_v6 = vadd.f32 0.5, %v383_v58  ;;  %v2268_v44 = vpop.permute.xlu1 %491  ;;  %v1670_v58 = vld [vmem:[%s2403_s5 + $0x4] ss:$8 sps:$4 sm:$0xff]  }
 0x14e   :  { %1543 = vmatpush3.bf16.msra.mxu1 %v689_v54  ;;  %v406_v8 = vpack.c.bf16 %v398_v59, %v397_v1  ;;  %v1711_v9 = vpop.eup %1710  ;;  %v380_v10 = vmul.f32 0.5, %v1709_v4  ;;  %v395_v11 = vadd.f32 0.5, %v382_v62  ;;  %1456 = vmatprep.mubr.msk.bf16.mxu0 %vm1091_vm4, %v1670_v58 }
 0x14f   :  { %1544 = vmatprep.subr.bf16.mxu1 %v1814_v2  ;;  %v1713_v12 = vpop.eup %1712  ;;  %v379_v13 = vmul.f32 0.5, %v1711_v9  ;;  %v394_v14 = vadd.f32 0.5, %v381_v5 }
 0x150   :  { %v405_v15 = vpack.c.bf16 %v396_v6, %v395_v11  ;;  %v378_v16 = vmul.f32 0.5, %v1713_v12  ;;  %v393_v17 = vadd.f32 0.5, %v380_v10 }
 0x151   :  { %v392_v18 = vadd.f32 0.5, %v379_v13  ;;  %v2272_v45 = vpop.permute.xlu1 %481 }
 0x152   :  { %1545 = vmatpush3.bf16.msra.mxu1 %v407_v60  ;;  %v404_v19 = vpack.c.bf16 %v394_v14, %v393_v17  ;;  %v391_v20 = vadd.f32 0.5, %v378_v16  ;;  %v1673_v60 = vld [vmem:[%s2403_s5 + $0x54] ss:$8 sps:$4 sm:$0xff]  }
 0x153   :  { %1546 = vmatprep.subr.bf16.mxu1 %v1814_v2 }
 0x154   :  { %v403_v21 = vpack.c.bf16 %v392_v18, %v391_v20 }
 0x155   :  { %v472_v37 = vpop.permute.xlu1 %471 }
 0x156   :  { %1547 = vmatpush3.bf16.msra.mxu1 %v406_v8 }
 0x157   :  { %1548 = vmatprep.subr.bf16.mxu1 %v1814_v2 }
 0x159   :  { %v462_v36 = vpop.permute.xlu1 %461 }
 0x15a   :  { %1549 = vmatpush3.bf16.msra.mxu1 %v405_v15 }
 0x15b   :  { %1550 = vmatprep.subr.bf16.mxu1 %v1814_v2 }
 0x15e   :  { %1551 = vmatpush3.bf16.msra.mxu1 %v404_v19 }
 0x15f   :  { %1552 = vmatprep.subr.bf16.mxu1 %v1814_v2 }
 0x162   :  { %1553 = vmatpush3.bf16.msra.mxu1 %v403_v21 }
 0x163   :  { %1554 = vmatprep.subr.bf16.mxu1 %v1814_v2 }
 0x166   :  { %1555 = vmatpush3.bf16.msra.mxu1 %v402_v3  ;;  %v1659_v3 = vld [vmem:[%s2401_s3 + $0x20] sm:$0xff]  }
 0x167   :  { %1608 = vmatprep.subr.bf16.mxu1 %v1815_v7 }
 0x169   :  { %1557 = vmatmul.mubr.msk.bf16.vlgmr.msra.gmra.mxu1 %vm647_vm3, %v1655_v22 }
 0x16a   :  { %1560 = vmatprep.mubr.msk.bf16.mxu1 %vm1816_vm1, %v1814_v2 }
 0x171   :  { %1561 = vmatmul.mubr.msk.bf16.gmra.mxu1 %vm647_vm3, %v1656_v23 }
 0x172   :  { %1564 = vmatprep.mubr.msk.bf16.mxu1 %vm1816_vm1, %v1814_v2 }
 0x179   :  { %1565 = vmatmul.mubr.msk.bf16.gmra.mxu1 %vm647_vm3, %v1657_v63 }
 0x17a   :  { %1568 = vmatprep.mubr.msk.bf16.mxu1 %vm1816_vm1, %v1814_v2 }
 0x181   :  { %1569 = vmatmul.mubr.msk.bf16.gmra.mxu1 %vm647_vm3, %v1658_v0 }
 0x182   :  { %1572 = vmatprep.mubr.msk.bf16.mxu1 %vm1816_vm1, %v1814_v2 }
 0x189   :  { %1573 = vmatmul.mubr.msk.bf16.gmra.mxu1 %vm647_vm3, %v1659_v3 }
 0x18a   :  { %1576 = vmatprep.mubr.msk.bf16.mxu1 %vm1816_vm1, %v1814_v2 }
 0x191   :  { %1577 = vmatmul.mubr.msk.bf16.gmra.mxu1 %vm647_vm3, %v1660_v24 }
 0x192   :  { %1580 = vmatprep.mubr.msk.bf16.mxu1 %vm1816_vm1, %v1814_v2 }
 0x199   :  { %1581 = vmatmul.mubr.msk.bf16.gmra.mxu1 %vm647_vm3, %v1661_v25 }
 0x19a   :  { %1584 = vmatprep.mubr.msk.bf16.mxu1 %vm1816_vm1, %v1814_v2 }
 0x1a1   :  { %1585 = vmatmul.mubr.msk.bf16.gmra.mxu1 %vm647_vm3, %v1662_v26 }
 0x1a2   :  { %1588 = vmatprep.mubr.msk.bf16.mxu1 %vm1816_vm1, %v1814_v2 }
 0x1a9   :  { %1589 = vmatmul.mubr.msk.bf16.gmra.mxu1 %vm647_vm3, %v1663_v27 }
 0x1aa   :  { %1592 = vmatprep.mubr.msk.bf16.mxu1 %vm1816_vm1, %v1814_v2 }
 0x1b1   :  { %1593 = vmatmul.mubr.msk.bf16.gmra.mxu1 %vm647_vm3, %v1664_v28 }
 0x1b2   :  { %1596 = vmatprep.mubr.msk.bf16.mxu1 %vm1816_vm1, %v1814_v2 }
 0x1b9   :  { %1597 = vmatmul.mubr.msk.bf16.gmra.mxu1 %vm647_vm3, %v1665_v40 }
 0x1ba   :  { %1600 = vmatprep.mubr.msk.bf16.mxu1 %vm1816_vm1, %v1814_v2 }
 0x1c1   :  { %1601 = vmatmul.mubr.msk.bf16.gmra.mxu1 %vm647_vm3, %v1666_v41 }
 0x1c2   :  { %1604 = vmatprep.mubr.msk.bf16.mxu1 %vm1816_vm1, %v1814_v2  ;;  %v2266_v2 = vpop.permute.xlu0 %506 }
 0x1c6   :  { %v2270_v34 = vpop.permute.xlu0 %496 }
 0x1c9   :  { %1605 = vmatmul.mubr.msk.bf16.gmra.mxu1 %vm647_vm3, %v1667_v30 }
 0x1ca   :  { %v2274_v46 = vpop.permute.xlu0 %486  ;;  %1461 = vmatprep.mubr.msk.bf16.mxu1 %vm1091_vm4, %v1673_v60 }
 0x1ce   :  { %v477_v47 = vpop.permute.xlu0 %476 }
 0x1d2   :  { %v467_v52 = vpop.permute.xlu0 %466 }
 0x229   :  { %v725_v48 = vpop.f32.mrf.mxu1 }
 0x22a   :  { %v726_v49 = vadd.f32 %v725_v48, %v462_v36 }
 0x22b   :  { %v1558_v39 = vpop.f32.mrf.mxu1 }
 0x22c   :  { %v827_v51 = vmul.f32 0.5, %v726_v49 }
 0x22d   :  { %v728_v38 = vpop.f32.mrf.mxu1 }
 0x22e   :  { %1714 = vtanh.f32 %v827_v51  ;;  %v729_v50 = vadd.f32 %v728_v38, %v467_v52 }
 0x22f   :  { %v1559_v53 = vpop.f32.mrf.mxu1 }
 0x230   :  { %v828_v54 = vmul.f32 0.5, %v729_v50 }
 0x231   :  { %v733_v55 = vpop.f32.mrf.mxu1 }
 0x232   :  { %1716 = vtanh.f32 %v828_v54  ;;  %v734_v56 = vadd.f32 %v733_v55, %v472_v37 }
 0x233   :  { %v1562_v57 = vpop.f32.mrf.mxu1 }
 0x234   :  { %v829_v59 = vmul.f32 0.5, %v734_v56 }
 0x235   :  { %v736_v61 = vpop.f32.mrf.mxu1 }
 0x236   :  { %1718 = vtanh.f32 %v829_v59  ;;  %v737_v62 = vadd.f32 %v736_v61, %v477_v47 }
 0x237   :  { %v1563_v1 = vpop.f32.mrf.mxu1 }
 0x238   :  { %v830_v4 = vmul.f32 0.5, %v737_v62 }
 0x239   :  { %v2284_v5 = vpop.f32.mrf.mxu1 }
 0x23a   :  { %1720 = vtanh.f32 %v830_v4 }
 0x23b   :  { %v1715_v6 = vpop.eup %1714  ;;  %v1566_v8 = vpop.f32.mrf.mxu1 }
 0x23c   :  { %v877_v10 = vmul.f32 0.5, %v1715_v6 }
 0x23d   :  { %v2286_v9 = vpop.f32.mrf.mxu1 }
 0x23e   :  { %v902_v15 = vadd.f32 0.5, %v877_v10  ;;  %v745_v10 = vadd.f32 %v2286_v9, %v2274_v46 }
 0x23f   :  { %v1717_v11 = vpop.eup %1716  ;;  %v1567_v12 = vpop.f32.mrf.mxu1 }
 0x240   :  { %v878_v13 = vmul.f32 0.5, %v1717_v11  ;;  %v742_v12 = vadd.f32 %v2284_v5, %v2272_v45 }
 0x241   :  { %v749_v14 = vpop.f32.mrf.mxu1 }
 0x242   :  { %v903_v16 = vadd.f32 0.5, %v878_v13 }
 0x243   :  { %v1719_v17 = vpop.eup %1718  ;;  %v1570_v18 = vpop.f32.mrf.mxu1 }
 0x244   :  { %v2288_v19 = vpack.c.bf16 %v903_v16, %v902_v15  ;;  %v879_v21 = vmul.f32 0.5, %v1719_v17  ;;  %v832_v16 = vmul.f32 0.5, %v745_v10  ;;  %v831_v18 = vmul.f32 0.5, %v742_v12 }
 0x245   :  { %v752_v20 = vpop.f32.mrf.mxu1 }
 0x246   :  { %v904_v3 = vadd.f32 0.5, %v879_v21  ;;  %v753_v4 = vadd.f32 %v752_v20, %v2270_v34  ;;  %v2314_v21 = vpop.permute.xlu1 %581 }
 0x247   :  { %v1721_v22 = vpop.eup %1720  ;;  %v1571_v23 = vpop.f32.mrf.mxu1 }
 0x248   :  { %v880_v63 = vmul.f32 0.5, %v1721_v22  ;;  %v834_v11 = vmul.f32 0.5, %v753_v4 }
 0x249   :  { %v757_v0 = vpop.f32.mrf.mxu1 }
 0x24a   :  { %v905_v24 = vadd.f32 0.5, %v880_v63 }
 0x24b   :  { %v1574_v25 = vpop.f32.mrf.mxu1 }
 0x24c   :  { %v2290_v26 = vpack.c.bf16 %v905_v24, %v904_v3 }
 0x24d   :  { %v760_v27 = vpop.f32.mrf.mxu1 }
 0x24f   :  { %v1575_v28 = vpop.f32.mrf.mxu1 }
 0x251   :  { %v765_v40 = vpop.f32.mrf.mxu1 }
 0x252   :  { %v766_v58 = vadd.f32 %v765_v40, %v2260_v32 }
 0x253   :  { %v1578_v41 = vpop.f32.mrf.mxu1 }
 0x254   :  { %v837_v62 = vmul.f32 0.5, %v766_v58 }
 0x255   :  { %v768_v30 = vpop.f32.mrf.mxu1 }
 0x256   :  { %v769_v53 = vadd.f32 %v768_v30, %v2262_v35  ;;  %v758_v35 = vadd.f32 %v757_v0, %v2264_v43 }
 0x257   :  { %v1579_v37 = vpop.f32.mrf.mxu1 }
 0x258   :  { %v838_v61 = vmul.f32 0.5, %v769_v53  ;;  %v577_v37 = vpop.permute.xlu1 %576 }
 0x259   :  { %v773_v47 = vpop.f32.mrf.mxu1 }
 0x25a   :  { %v774_v51 = vadd.f32 %v773_v47, %v2256_v42 }
 0x25b   :  { %v1582_v36 = vpop.f32.mrf.mxu1 }
 0x25c   :  { %v839_v56 = vmul.f32 0.5, %v774_v51  ;;  %v567_v58 = vpop.permute.xlu1 %566 }
 0x25d   :  { %v776_v48 = vpop.f32.mrf.mxu1 }
 0x25e   :  { %v777_v39 = vadd.f32 %v776_v48, %v2258_v29  ;;  %v761_v29 = vadd.f32 %v760_v27, %v2266_v2  ;;  %v835_v2 = vmul.f32 0.5, %v758_v35 }
 0x25f   :  { %v1583_v49 = vpop.f32.mrf.mxu1 }
 0x260   :  { %v840_v54 = vmul.f32 0.5, %v777_v39  ;;  %v836_v32 = vmul.f32 0.5, %v761_v29  ;;  %v572_v39 = vpop.permute.xlu0 %571 }
 0x261   :  { %v781_v52 = vpop.f32.mrf.mxu1 }
 0x262   :  { %v782_v38 = vadd.f32 %v781_v52, %v2252_v31 }
 0x263   :  { %v1586_v50 = vpop.f32.mrf.mxu1 }
 0x264   :  { %v841_v55 = vmul.f32 0.5, %v782_v38  ;;  %v562_v35 = vpop.permute.xlu0 %561 }
 0x265   :  { %v784_v57 = vpop.f32.mrf.mxu1 }
 0x266   :  { %1722 = vtanh.f32 %v841_v55  ;;  %v785_v59 = vadd.f32 %v784_v57, %v2254_v33  ;;  %v750_v33 = vadd.f32 %v749_v14, %v2268_v44 }
 0x267   :  { %v1587_v60 = vpop.f32.mrf.mxu1  ;;  %1724 = vtanh.f32 %v840_v54 }
 0x268   :  { %v842_v42 = vmul.f32 0.5, %v785_v59  ;;  %1726 = vtanh.f32 %v839_v56  ;;  %v833_v34 = vmul.f32 0.5, %v750_v33 }
 0x269   :  { %v2299_v31 = vpop.f32.mrf.mxu1 }
 0x26a   :  { %1728 = vtanh.f32 %v842_v42 }
 0x26b   :  { %v1590_v1 = vpop.f32.mrf.mxu1  ;;  %1730 = vtanh.f32 %v838_v61 }
 0x26c   :  { %1732 = vtanh.f32 %v837_v62 }
 0x26d   :  { %v2303_v6 = vpop.f32.mrf.mxu1  ;;  %1734 = vtanh.f32 %v836_v32 }
 0x26e   :  { %1736 = vtanh.f32 %v835_v2 }
 0x26f   :  { %v1591_v8 = vpop.f32.mrf.mxu1  ;;  %1738 = vtanh.f32 %v834_v11 }
 0x270   :  { %1740 = vtanh.f32 %v833_v34 }
 0x271   :  { %v2308_v43 = vpop.f32.mrf.mxu1  ;;  %1742 = vtanh.f32 %v832_v16 }
 0x272   :  { %1744 = vtanh.f32 %v831_v18 }
 0x273   :  { %v1723_v13 = vpop.eup %1722  ;;  %v1594_v15 = vpop.f32.mrf.mxu1 }
 0x274   :  { %v1725_v44 = vpop.eup %1724  ;;  %v891_v46 = vmul.f32 0.5, %v1723_v13  ;;  %v557_v15 = vpop.permute.xlu1 %556 }
 0x275   :  { %v2312_v14 = vpop.f32.mrf.mxu1  ;;  %v1727_v17 = vpop.eup %1726  ;;  %v890_v22 = vmul.f32 0.5, %v1725_v44 }
 0x276   :  { %v889_v63 = vmul.f32 0.5, %v1727_v17  ;;  %v916_v0 = vadd.f32 0.5, %v891_v46 }
 0x277   :  { %v1729_v9 = vpop.eup %1728  ;;  %v1595_v20 = vpop.f32.mrf.mxu1  ;;  %v915_v28 = vadd.f32 0.5, %v890_v22 }
 0x278   :  { %v892_v45 = vmul.f32 0.5, %v1729_v9  ;;  %v1731_v5 = vpop.eup %1730  ;;  %v914_v36 = vadd.f32 0.5, %v889_v63  ;;  %v552_v20 = vpop.permute.xlu0 %551  ;;  %v801_v63 = vadd.f32 %v2312_v14, %v557_v15  ;;  %v1674_v15 = vld [vmem:[%s2403_s5 + $0x14] ss:$8 sps:$4 sm:$0xff]  }
 0x279   :  { %v2316_v23 = vpop.f32.mrf.mxu1  ;;  %v1733_v24 = vpop.eup %1732  ;;  %v888_v27 = vmul.f32 0.5, %v1731_v5 }
 0x27a   :  { %v917_v3 = vadd.f32 0.5, %v892_v45  ;;  %v1735_v41 = vpop.eup %1734  ;;  %v887_v47 = vmul.f32 0.5, %v1733_v24  ;;  %v933_v38 = vpack.c.bf16 %v915_v28, %v914_v36  ;;  %v806_v18 = vadd.f32 %v2316_v23, %v562_v35 }
 0x27b   :  { %v1598_v25 = vpop.f32.mrf.mxu1  ;;  %v1737_v48 = vpop.eup %1736  ;;  %v886_v51 = vmul.f32 0.5, %v1735_v41  ;;  %v913_v52 = vadd.f32 0.5, %v888_v27  ;;  %v798_v23 = vadd.f32 %v2308_v43, %v552_v20  ;;  %v1685_v20 = vld [vmem:[%s2403_s5 + $0x44] ss:$8 sps:$4 sm:$0xff]  }
 0x27c   :  { %v934_v40 = vpack.c.bf16 %v917_v3, %v916_v0  ;;  %v1739_v50 = vpop.eup %1738  ;;  %v885_v54 = vmul.f32 0.5, %v1737_v48  ;;  %v912_v55 = vadd.f32 0.5, %v887_v47  ;;  %v847_v24 = vmul.f32 0.5, %v806_v18  ;;  %v547_v27 = vpop.permute.xlu1 %546  ;;  %v1681_v18 = vld [vmem:[%s2403_s5 + $0x20] ss:$8 sps:$4 sm:$0xff]  }
 0x27d   :  { %v808_v30 = vpop.f32.mrf.mxu1  ;;  %v1741_v56 = vpop.eup %1740  ;;  %v884_v59 = vmul.f32 0.5, %v1739_v50  ;;  %v911_v60 = vadd.f32 0.5, %v886_v51  ;;  %v793_v14 = vadd.f32 %v2303_v6, %v547_v27 }
 0x27e   :  { %1118 = vmatpush1.bf16.msra.mxu0 %v934_v40  ;;  %1621 = vmatpush1.bf16.msra.mxu1 %v934_v40  ;;  %v932_v29 = vpack.c.bf16 %v913_v52, %v912_v55  ;;  %v1743_v61 = vpop.eup %1742  ;;  %v883_v62 = vmul.f32 0.5, %v1741_v56  ;;  %v910_v1 = vadd.f32 0.5, %v885_v54  ;;  %v809_v12 = vadd.f32 %v808_v30, %v567_v58  ;;  %v542_v41 = vpop.permute.xlu0 %541 }
 0x27f   :  { %v1599_v49 = vpop.f32.mrf.mxu1  ;;  %1119 = vmatprep.subr.bf16.mxu0 %v1815_v7  ;;  %1609 = vmatprep.subr.bf16.mxu1 %v1815_v7  ;;  %v1745_v32 = vpop.eup %1744  ;;  %v882_v8 = vmul.f32 0.5, %v1743_v61  ;;  %v909_v10 = vadd.f32 0.5, %v884_v59  ;;  %v846_v40 = vmul.f32 0.5, %v801_v63  ;;  %v790_v30 = vadd.f32 %v2299_v31, %v542_v41 }
 0x280   :  { %v931_v11 = vpack.c.bf16 %v911_v60, %v910_v1  ;;  %v881_v16 = vmul.f32 0.5, %v1745_v32  ;;  %v908_v44 = vadd.f32 0.5, %v883_v62  ;;  %v848_v0 = vmul.f32 0.5, %v809_v12 }
 0x281   :  { %v813_v53 = vpop.f32.mrf.mxu1  ;;  %v907_v22 = vadd.f32 0.5, %v882_v8  ;;  %v844_v43 = vmul.f32 0.5, %v793_v14  ;;  %v843_v6 = vmul.f32 0.5, %v790_v30 }
 0x282   :  { %1120 = vmatpush1.bf16.msra.mxu0 %v933_v38  ;;  %1622 = vmatpush1.bf16.msra.mxu1 %v933_v38  ;;  %v814_v33 = vadd.f32 %v813_v53, %v572_v39  ;;  %v930_v5 = vpack.c.bf16 %v909_v10, %v908_v44 }
 0x283   :  { %v1602_v57 = vpop.f32.mrf.mxu1  ;;  %1121 = vmatprep.subr.bf16.mxu0 %v1815_v7  ;;  %1610 = vmatprep.subr.bf16.mxu1 %v1815_v7 }
 0x284   :  { %v849_v46 = vmul.f32 0.5, %v814_v33 }
 0x285   :  { %v816_v42 = vpop.f32.mrf.mxu1 }
 0x286   :  { %v817_v4 = vadd.f32 %v816_v42, %v577_v37  ;;  %1122 = vmatpush1.bf16.msra.mxu0 %v932_v29  ;;  %1623 = vmatpush1.bf16.msra.mxu1 %v932_v29  ;;  %v845_v37 = vmul.f32 0.5, %v798_v23 }
 0x287   :  { %v1603_v2 = vpop.f32.mrf.mxu1  ;;  %1123 = vmatprep.subr.bf16.mxu0 %v1815_v7  ;;  %1611 = vmatprep.subr.bf16.mxu1 %v1815_v7 }
 0x288   :  { %v850_v34 = vmul.f32 0.5, %v817_v4 }
 0x289   :  { %v821_v13 = vpop.f32.mrf.mxu1 }
 0x28a   :  { %v822_v17 = vadd.f32 %v821_v13, %v2314_v21  ;;  %1124 = vmatpush1.bf16.msra.mxu0 %v931_v11  ;;  %1624 = vmatpush1.bf16.msra.mxu1 %v931_v11  ;;  %1746 = vtanh.f32 %v850_v34  ;;  %v906_v21 = vadd.f32 0.5, %v881_v16  ;;  %v952_v11 = vld [vmem:[%s2403_s5 + $0x60] sm:$0x33]  ;;  %v1671_v13 = vld [vmem:[%s2403_s5 + $0x50] ss:$8 sps:$4 sm:$0xff]  }
 0x28b   :  { %1125 = vmatprep.subr.bf16.mxu0 %v1815_v7  ;;  %1612 = vmatprep.subr.bf16.mxu1 %v1815_v7  ;;  %v1606_v9 = vpop.f32.mrf.mxu1  ;;  %v1668_v34 = vld [vmem:[%s2403_s5] ss:$8 sps:$4 sm:$0xff]   ;;  %v1677_v16 = vld [vmem:[%s2403_s5 + $0x10] ss:$8 sps:$4 sm:$0xff]   ;;  %v1454_v44 = vcombine.low %v952_v11, %v952_v11 }
 0x28c   :  { %v851_v45 = vmul.f32 0.5, %v822_v17  ;;  %v929_v28 = vpack.c.bf16 %v907_v22, %v906_v21  ;;  %v1679_v17 = vld [vmem:[%s2403_s5 + $0x24] ss:$8 sps:$4 sm:$0xff]   ;;  %v1684_v9 = vld [vmem:[%s2403_s5 + $0x30] ss:$8 sps:$4 sm:$0xff]  }
 0x28d   :  { %v824_v3 = vpop.f32.mrf.mxu1  ;;  %v1687_v22 = vld [vmem:[%s2403_s5 + $0x40] ss:$8 sps:$4 sm:$0xff]  }
 0x28e   :  { %1748 = vtanh.f32 %v851_v45  ;;  %1126 = vmatpush1.bf16.msra.mxu0 %v930_v5  ;;  %1625 = vmatpush1.bf16.msra.mxu1 %v930_v5  ;;  %v969_v45 = vpop.permute.xlu0 %968  ;;  %v974_v5 = vpop.permute.xlu1 %973 }
 0x28f   :  { %1750 = vtanh.f32 %v849_v46  ;;  %1127 = vmatprep.subr.bf16.mxu0 %v1815_v7  ;;  %1613 = vmatprep.subr.bf16.mxu1 %v1815_v7  ;;  %v1607_v25 = vpop.f32.mrf.mxu1  ;;  %v1682_v46 = vld [vmem:[%s2403_s5 + $0x34] ss:$8 sps:$4 sm:$0xff]   ;;  %s1817_s5 = smov [#allocation3]  }
 0x290   :  { %1752 = vtanh.f32 %v848_v0  ;;  %s1386_s18 = sshll.u32 %s1817_s5, 4  ;;  %s1387_s18 = int_to_ptr.vmem [resolvable:$true] %s1386_s18 }
 0x291   :  { %1754 = vtanh.f32 %v847_v24  ;;  %s1792_s19 = scalar_lea.vmem %s1387_s18, 16  ;;  %s1796_s20 = scalar_lea.vmem %s1387_s18, 32 }
 0x292   :  { %1128 = vmatpush1.bf16.msra.mxu0 %v929_v28  ;;  %1626 = vmatpush1.bf16.msra.mxu1 %v929_v28  ;;  %1756 = vtanh.f32 %v846_v40  ;;  %v979_v63 = vpop.permute.xlu0 %978  ;;  %v984_v0 = vpop.permute.xlu1 %983  ;;  %p1793_p0 = scmp.ne.s32.totalorder %s1387_s18, %s1792_s19  ;;  %p1797_p1 = scmp.lt.s32.totalorder %s1387_s18, %s1387_s18 }
 0x293   :  { %1129 = vmatprep.subr.bf16.mxu0 %v1815_v7  ;;  %1614 = vmatprep.subr.bf16.mxu1 %v1815_v7  ;;  %1758 = vtanh.f32 %v845_v37  ;;  %p1798_p2 = scmp.lt.s32.totalorder %s1796_s20, %s1792_s19 }
 0x294   :  { %1760 = vtanh.f32 %v844_v43 }
 0x295   :  { %1762 = vtanh.f32 %v843_v6  ;;  %p1799_p3 = por %p1798_p2, %p1797_p1 }
 0x296   :  { %1130 = vmatpush1.bf16.msra.mxu0 %v2290_v26  ;;  %1627 = vmatpush1.bf16.msra.mxu1 %v2290_v26  ;;  %v989_v23 = vpop.permute.xlu0 %988  ;;  %v994_v24 = vpop.permute.xlu1 %993 }
 0x297   :  { %1131 = vmatprep.subr.bf16.mxu0 %v1815_v7  ;;  %1615 = vmatprep.subr.bf16.mxu1 %v1815_v7  ;;  %v1747_v31 = vpop.eup %1746  ;;  %p1800_p4 = pnand %p1799_p3, %p1793_p0 }
 0x298   :  { %v900_v48 = vmul.f32 0.5, %v1747_v31 }
 0x29a   :  { %1132 = vmatpush1.bf16.msra.mxu0 %v2288_v19  ;;  %1628 = vmatpush1.bf16.msra.mxu1 %v2288_v19  ;;  %v925_v53 = vadd.f32 0.5, %v900_v48  ;;  %v999_v30 = vpop.permute.xlu0 %998  ;;  %v1004_v37 = vpop.permute.xlu1 %1003 }
 0x29b   :  { %v1749_v47 = vpop.eup %1748  ;;  %1139 = vmatprep.subr.bf16.mxu0 %v1815_v7  ;;  %1616 = vmatprep.subr.bf16.mxu1 %v1815_v7 }
 0x29c   :  { %v1751_v36 = vpop.eup %1750  ;;  %v901_v26 = vmul.f32 0.5, %v1749_v47 }
 0x29d   :  { %v1753_v49 = vpop.eup %1752  ;;  %v899_v51 = vmul.f32 0.5, %v1751_v36 }
 0x29e   :  { %v926_v39 = vadd.f32 0.5, %v901_v26  ;;  %v1755_v52 = vpop.eup %1754  ;;  %v898_v50 = vmul.f32 0.5, %v1753_v49 }
 0x29f   :  { %v1757_v54 = vpop.eup %1756  ;;  %v897_v55 = vmul.f32 0.5, %v1755_v52  ;;  %v924_v56 = vadd.f32 0.5, %v899_v51  ;;  %v1009_v51 = vpop.permute.xlu0 %1008 }
 0x2a0   :  { %v939_v38 = vpack.c.bf16 %v926_v39, %v926_v39  ;;  %v1759_v57 = vpop.eup %1758  ;;  %v896_v58 = vmul.f32 0.5, %v1757_v54  ;;  %v923_v59 = vadd.f32 0.5, %v898_v50  ;;  %v2391_v52 = vpop.permute.xlu1 %1013 }
 0x2a1   :  { %v938_v60 = vpack.c.bf16 %v925_v53, %v924_v56  ;;  %v1761_v29 = vpop.eup %1760  ;;  %v895_v61 = vmul.f32 0.5, %v1759_v57  ;;  %v922_v42 = vadd.f32 0.5, %v897_v55 }
 0x2a2   :  { %v1115_v19 = vsel %vm1113_vm5, %v939_v38, 0  ;;  %v1763_v35 = vpop.eup %1762  ;;  %v894_v62 = vmul.f32 0.5, %v1761_v29  ;;  %v921_v1 = vadd.f32 0.5, %v896_v58 }
 0x2a3   :  { %1140 = vmatpush2.bf16.msra.mxu0 %v1115_v19  ;;  %1629 = vmatpush2.bf16.msra.mxu1 %v1115_v19  ;;  %v937_v4 = vpack.c.bf16 %v923_v59, %v922_v42  ;;  %v893_v32 = vmul.f32 0.5, %v1763_v35  ;;  %v920_v33 = vadd.f32 0.5, %v895_v61  ;;  %v1019_v61 = vpop.permute.xlu0 %1018 }
 0x2a4   :  { %1141 = vmatprep.subr.bf16.mxu0 %v1815_v7  ;;  %1617 = vmatprep.subr.bf16.mxu1 %v1815_v7  ;;  %v919_v2 = vadd.f32 0.5, %v894_v62 }
 0x2a5   :  { %v936_v8 = vpack.c.bf16 %v921_v1, %v920_v33  ;;  %v918_v10 = vadd.f32 0.5, %v893_v32 }
 0x2a7   :  { %1142 = vmatpush2.bf16.msra.mxu0 %v938_v60  ;;  %1630 = vmatpush2.bf16.msra.mxu1 %v938_v60  ;;  %v935_v12 = vpack.c.bf16 %v919_v2, %v918_v10  ;;  %v1024_v60 = vpop.permute.xlu1 %1023  ;;  %v1029_v2 = vpop.permute.xlu0 %1028 }
 0x2a8   :  { %1143 = vmatprep.subr.bf16.mxu0 %v1815_v7  ;;  %1618 = vmatprep.subr.bf16.mxu1 %v1815_v7 }
 0x2ab   :  { %1144 = vmatpush2.bf16.msra.mxu0 %v937_v4  ;;  %1631 = vmatpush2.bf16.msra.mxu1 %v937_v4  ;;  %v1273_v32 = vpop.permute.xlu1 %1272 }
 0x2ac   :  { %1145 = vmatprep.subr.bf16.mxu0 %v1815_v7  ;;  %1619 = vmatprep.subr.bf16.mxu1 %v1815_v7 }
 0x2af   :  { %1146 = vmatpush2.bf16.msra.mxu0 %v936_v8  ;;  %1632 = vmatpush2.bf16.msra.mxu1 %v936_v8 }
 0x2b0   :  { %1147 = vmatprep.subr.bf16.mxu0 %v1815_v7  ;;  %1620 = vmatprep.subr.bf16.mxu1 %v1815_v7  ;;  %v1455_v7 = vcombine.high %v952_v11, %v952_v11 }
 0x2b3   :  { %1148 = vmatpush2.bf16.msra.mxu0 %v935_v12  ;;  %1633 = vmatpush2.bf16.msra.mxu1 %v935_v12 }
 0x2b6   :  { %1150 = vmatmul.mubr.bf16.vlgmr.msra.gmra.mxu0 %v1668_v34  ;;  %1190 = vmatmul.mubr.bf16.vlgmr.msra.gmra.mxu1 %v1671_v13 }
 0x2b7   :  { %1457 = vmatprep.mubr.msk.bf16.mxu0 %vm1091_vm4, %v1674_v15  ;;  %1462 = vmatprep.mubr.msk.bf16.mxu1 %vm1091_vm4, %v1455_v7 }
 0x2be   :  { %1158 = vmatmul.mubr.bf16.gmra.mxu0 %v1677_v16  ;;  %1198 = vmatmul.mubr.bf16.gmra.mxu1 %v1454_v44 }
 0x2bf   :  { %1458 = vmatprep.mubr.msk.bf16.mxu0 %vm1091_vm4, %v1679_v17  ;;  %v1283_v17 = vpop.permute.xlu1 %1282 }
 0x2c6   :  { %1166 = vmatmul.mubr.bf16.gmra.mxu0 %v1681_v18 }
 0x2c7   :  { %1459 = vmatprep.mubr.msk.bf16.mxu0 %vm1091_vm4, %v1682_v46 }
 0x2ce   :  { %1174 = vmatmul.mubr.bf16.gmra.mxu0 %v1684_v9 }
 0x2cf   :  { %1460 = vmatprep.mubr.msk.bf16.mxu0 %vm1091_vm4, %v1685_v20  ;;  %v1278_v20 = vpop.permute.xlu0 %1277 }
 0x2d6   :  { %1182 = vmatmul.mubr.bf16.gmra.mxu0 %v1687_v22 }
 0x376   :  { %v1151_v3 = vpop.f32.mrf.mxu0  ;;  %v1191_v21 = vpop.f32.mrf.mxu1 }
 0x377   :  { %v1152_v47 = vadd.f32 %v1151_v3, %v969_v45  ;;  %v1192_v10 = vadd.f32 %v1191_v21, %v1019_v61 }
 0x378   :  { %v1153_v25 = vpop.f32.mrf.mxu0  ;;  %v1193_v27 = vpop.f32.mrf.mxu1 }
 0x379   :  { %v1205_v53 = vmul.f32 0.5, %v1152_v47  ;;  %v1215_v18 = vmul.f32 0.5, %v1192_v10 }
 0x37a   :  { %v1154_v28 = vpop.f32.mrf.mxu0  ;;  %v1194_v14 = vpop.f32.mrf.mxu1 }
 0x37b   :  { %v1155_v31 = vadd.f32 %v1154_v28, %v974_v5  ;;  %v1195_v12 = vadd.f32 %v1194_v14, %v1024_v60  ;;  %v1293_v14 = vpop.permute.xlu1 %1292 }
 0x37c   :  { %v1156_v40 = vpop.f32.mrf.mxu0  ;;  %v1196_v41 = vpop.f32.mrf.mxu1 }
 0x37d   :  { %v1206_v38 = vmul.f32 0.5, %v1155_v31  ;;  %v1216_v22 = vmul.f32 0.5, %v1195_v12 }
 0x37e   :  { %v1159_v43 = vpop.f32.mrf.mxu0  ;;  %v1199_v6 = vpop.f32.mrf.mxu1 }
 0x37f   :  { %v1160_v48 = vadd.f32 %v1159_v43, %v979_v63  ;;  %1764 = vtanh.f32 %v1206_v38  ;;  %v1200_v7 = vadd.f32 %v1199_v6, %v1029_v2  ;;  %v1288_v43 = vpop.permute.xlu0 %1287  ;;  %v1303_v38 = vpop.permute.xlu1 %1302 }
 0x380   :  { %v1161_v36 = vpop.f32.mrf.mxu0  ;;  %v1201_v26 = vpop.f32.mrf.mxu1  ;;  %1766 = vtanh.f32 %v1205_v53 }
 0x381   :  { %v1207_v55 = vmul.f32 0.5, %v1160_v48  ;;  %v1217_v3 = vmul.f32 0.5, %v1200_v7 }
 0x382   :  { %v1162_v49 = vpop.f32.mrf.mxu0  ;;  %v1202_v39 = vpop.f32.mrf.mxu1 }
 0x383   :  { %v1163_v50 = vadd.f32 %v1162_v49, %v984_v0  ;;  %1768 = vtanh.f32 %v1207_v55  ;;  %v1298_v55 = vpop.permute.xlu0 %1297 }
 0x384   :  { %v1164_v54 = vpop.f32.mrf.mxu0  ;;  %v1203_v19 = vpop.f32.mrf.mxu1 }
 0x385   :  { %v1208_v57 = vmul.f32 0.5, %v1163_v50 }
 0x386   :  { %v1167_v56 = vpop.f32.mrf.mxu0 }
 0x387   :  { %v1168_v58 = vadd.f32 %v1167_v56, %v989_v23  ;;  %1770 = vtanh.f32 %v1208_v57 }
 0x388   :  { %v1169_v59 = vpop.f32.mrf.mxu0 }
 0x389   :  { %v1209_v29 = vmul.f32 0.5, %v1168_v58 }
 0x38a   :  { %v1170_v42 = vpop.f32.mrf.mxu0 }
 0x38b   :  { %v1171_v35 = vadd.f32 %v1170_v42, %v994_v24  ;;  %1772 = vtanh.f32 %v1209_v29 }
 0x38c   :  { %v1172_v62 = vpop.f32.mrf.mxu0  ;;  %v1765_v15 = vpop.eup %1764 }
 0x38d   :  { %v1210_v1 = vmul.f32 0.5, %v1171_v35  ;;  %v1767_v44 = vpop.eup %1766  ;;  %v1232_v5 = vmul.f32 0.5, %v1765_v15  ;;  %v1313_v62 = vpop.permute.xlu1 %1312 }
 0x38e   :  { %v1175_v4 = vpop.f32.mrf.mxu0  ;;  %v1231_v23 = vmul.f32 0.5, %v1767_v44 }
 0x38f   :  { %1774 = vtanh.f32 %v1210_v1  ;;  %v1176_v33 = vadd.f32 %v1175_v4, %v999_v30  ;;  %v1245_v40 = vadd.f32 0.5, %v1232_v5 }
 0x390   :  { %v1177_v8 = vpop.f32.mrf.mxu0  ;;  %v1769_v9 = vpop.eup %1768  ;;  %v1244_v31 = vadd.f32 0.5, %v1231_v23 }
 0x391   :  { %v1211_v11 = vmul.f32 0.5, %v1176_v33  ;;  %v1233_v24 = vmul.f32 0.5, %v1769_v9  ;;  %v1336_v48 = vmul.f32 %v1278_v20, %v1245_v40 }
 0x392   :  { %v1178_v34 = vpop.f32.mrf.mxu0  ;;  %v1335_v50 = vmul.f32 %v1273_v32, %v1244_v31  ;;  %v1308_v32 = vpop.permute.xlu0 %1307 }
 0x393   :  { %1776 = vtanh.f32 %v1211_v11  ;;  %v1179_v13 = vadd.f32 %v1178_v34, %v1004_v37  ;;  %v1246_v47 = vadd.f32 0.5, %v1233_v24 }
 0x394   :  { %v1180_v16 = vpop.f32.mrf.mxu0  ;;  %v1771_v0 = vpop.eup %1770 }
 0x395   :  { %v1212_v46 = vmul.f32 0.5, %v1179_v13  ;;  %v1234_v41 = vmul.f32 0.5, %v1771_v0  ;;  %v1337_v53 = vmul.f32 %v1283_v17, %v1246_v47  ;;  %v1323_v17 = vpop.permute.xlu1 %1322 }
 0x396   :  { %v1183_v45 = vpop.f32.mrf.mxu0 }
 0x397   :  { %1778 = vtanh.f32 %v1212_v46  ;;  %v1184_v63 = vadd.f32 %v1183_v45, %v1009_v51  ;;  %v1247_v49 = vadd.f32 0.5, %v1234_v41 }
 0x398   :  { %v1185_v21 = vpop.f32.mrf.mxu0  ;;  %1780 = vtanh.f32 %v1215_v18  ;;  %v1773_v27 = vpop.eup %1772 }
 0x399   :  { %v1213_v25 = vmul.f32 0.5, %v1184_v63  ;;  %1782 = vtanh.f32 %v1216_v22  ;;  %v1235_v36 = vmul.f32 0.5, %v1773_v27  ;;  %v1338_v56 = vmul.f32 %v1288_v43, %v1247_v49  ;;  %v1318_v22 = vpop.permute.xlu0 %1317  ;;  %v1333_v24 = vpop.permute.xlu1 %1332 }
 0x39a   :  { %v1186_v28 = vpop.f32.mrf.mxu0  ;;  %v1373_v43 = vlaneseq }
 0x39b   :  { %1784 = vtanh.f32 %v1213_v25  ;;  %v1187_v30 = vadd.f32 %v1186_v28, %v2391_v52  ;;  %v1248_v54 = vadd.f32 0.5, %v1235_v36  ;;  %v1348_v52 = vadd.f32 %v1336_v48, %v1335_v50 }
 0x39c   :  { %v1775_v37 = vpop.eup %1774  ;;  %1786 = vtanh.f32 %v1217_v3  ;;  %v1188_v6 = vpop.f32.mrf.mxu0  ;;  %v1374_v47 = vshrl.u32 %v1373_v43, 7 }
 0x39d   :  { %v1214_v26 = vmul.f32 0.5, %v1187_v30  ;;  %v1236_v39 = vmul.f32 0.5, %v1775_v37  ;;  %v1349_v59 = vadd.f32 %v1348_v52, %v1337_v53  ;;  %v1339_v60 = vmul.f32 %v1293_v14, %v1248_v54  ;;  %v1328_v28 = vpop.permute.xlu0 %1327 }
 0x39e   :  { %v1375_v48 = vsub.s32 0, %v1374_v47 }
 0x39f   :  { %1788 = vtanh.f32 %v1214_v26  ;;  %v1249_v57 = vadd.f32 0.5, %v1236_v39  ;;  %v1350_v1 = vadd.f32 %v1349_v59, %v1338_v56 }
 0x3a0   :  { %v1777_v51 = vpop.eup %1776 }
 0x3a1   :  { %v1237_v19 = vmul.f32 0.5, %v1777_v51  ;;  %v1340_v4 = vmul.f32 %v1298_v55, %v1249_v57  ;;  %v1351_v10 = vadd.f32 %v1350_v1, %v1339_v60  ;;  %v1371_v39 = vpop.permute.xlu0 %1370 }
 0x3a3   :  { %v1250_v29 = vadd.f32 0.5, %v1237_v19  ;;  %v1352_v13 = vadd.f32 %v1351_v10, %v1340_v4 }
 0x3a4   :  { %v1779_v58 = vpop.eup %1778 }
 0x3a5   :  { %v1238_v61 = vmul.f32 0.5, %v1779_v58  ;;  %v1781_v42 = vpop.eup %1780  ;;  %v1341_v11 = vmul.f32 %v1303_v38, %v1250_v29  ;;  %v1376_v38 = vrot.slane %v1371_v39, %v1375_v48 }
 0x3a6   :  { %v1783_v35 = vpop.eup %1782  ;;  %v1241_v34 = vmul.f32 0.5, %v1781_v42 }
 0x3a7   :  { %v1251_v33 = vadd.f32 0.5, %v1238_v61  ;;  %v1242_v18 = vmul.f32 0.5, %v1783_v35  ;;  %v1353_v46 = vadd.f32 %v1352_v13, %v1341_v11 }
 0x3a8   :  { %v1785_v2 = vpop.eup %1784  ;;  %v1254_v45 = vadd.f32 0.5, %v1241_v34 }
 0x3a9   :  { %v1787_v8 = vpop.eup %1786  ;;  %v1239_v12 = vmul.f32 0.5, %v1785_v2  ;;  %v1342_v15 = vmul.f32 %v1308_v32, %v1251_v33  ;;  %v1255_v3 = vadd.f32 0.5, %v1242_v18 }
 0x3aa   :  { %v1243_v44 = vmul.f32 0.5, %v1787_v8  ;;  %v1345_v25 = vmul.f32 %v1323_v17, %v1254_v45 }
 0x3ab   :  { %v1252_v7 = vadd.f32 0.5, %v1239_v12  ;;  %v1354_v5 = vadd.f32 %v1353_v46, %v1342_v15  ;;  %v1346_v40 = vmul.f32 %v1328_v28, %v1255_v3 }
 0x3ac   :  { %v1789_v16 = vpop.eup %1788  ;;  %v1256_v0 = vadd.f32 0.5, %v1243_v44 }
 0x3ad   :  { %v1343_v9 = vmul.f32 %v1313_v62, %v1252_v7  ;;  %v1240_v20 = vmul.f32 0.5, %v1789_v16 }
 0x3ae   :  { %v1347_v14 = vmul.f32 %v1333_v24, %v1256_v0 }
 0x3af   :  { %v1253_v63 = vadd.f32 0.5, %v1240_v20  ;;  %v1355_v21 = vadd.f32 %v1354_v5, %v1343_v9 }
 0x3b0   :  { %v1359_v37 = vsel %vm1113_vm5, %v1347_v14, 0.0 }
 0x3b1   :  { %v1344_v23 = vmul.f32 %v1318_v22, %v1253_v63 }
 0x3b3   :  { %v1356_v27 = vadd.f32 %v1355_v21, %v1344_v23 }
 0x3b5   :  { %v1357_v41 = vadd.f32 %v1356_v27, %v1345_v25 }
 0x3b7   :  { %v1358_v30 = vadd.f32 %v1357_v41, %v1346_v40 }
 0x3b9   :  { %v1360_v6 = vadd.f32 %v1359_v37, %v1358_v30 }
 0x3bb   :  { %v1361_v31 = vrot.slane %v1360_v6, 4 }
 0x3bd   :  { %v1362_v36 = vadd.f32 %v1361_v31, %v1360_v6 }
 0x3bf   :  { %v1363_v26 = vrot.slane %v1362_v36, 2 }
 0x3c1   :  { %v1364_v49 = vadd.f32 %v1363_v26, %v1362_v36 }
 0x3c3   :  { %v1365_v51 = vrot.slane %v1364_v49, 1 }
 0x3c5   :  { %v1366_v50 = vadd.f32 %v1365_v51, %v1364_v49 }
 0x3c7   :  { %v1377_v53 = vadd.f32 %v1376_v38, %v1366_v50 }
 0x3c9   :  { %1790 = vtanh.f32 %v1377_v53 }
 0x3d6   :  { %v1791_v54 = vpop.eup %1790 }
 0x3d7   :  { %1379 = vst [vmem:[#allocation3] sm:$0x1] %v1791_v54 }
 0x3d8   :  { %1803 = shalt.err (!%p1800_p4)
}
 0x3d9   :  { %1389 = dma.vmem_to_hbm [thread:$0]  %s1387_s18, 16, %s2407_s9, [#allocation4]  }
 0x3da   :  { %1812 = dma.done.wait [#allocation4], 16  }
 0x3db   :  { %1813 = vsyncadd [#allocation4], 4294967280 }
 0x3dc   :  { %1393 = vsyncpa [#allocation4], 1 }

</bundles_post_ra>
